<compile_context>
chip_gen: v7x
topology: tpu7x:2x2x1
jax: 0.10.0
libtpu: 0.0.40
codegen_flags: <defaults>
</compile_context>

<pallas_src>
import jax
import jax.numpy as jnp
from jax.experimental import pallas as pl
from jax.experimental.pallas import tpu as pltpu


def _num_tensorcore_shards():
    """2 on v7x (two TensorCores per chip), 1 on single-TC chips (v5e/v6e/...)."""
    try:
        kind = jax.devices()[0].device_kind.lower()
    except Exception:
        return 1
    return 2 if ("v7" in kind or "7x" in kind) else 1


def _nll_pick_sum_kernel(pred_ref, tgt_ref, out_ref):
    """Accumulate per-lane partial sums of pred[i, target[i]] for this shard.

    pred_ref: (TR, W) lane-packed log-probs (f32 or bf16; upcast in-register).
    tgt_ref : (TR, RPP) int32 flat lane offsets; -1 => never picked.
    out_ref : (1, 1, W) f32 output block, resident across the step axis.
    """
    s = pl.program_id(1)

    @pl.when(s == 0)
    def _init():
        out_ref[...] = jnp.zeros_like(out_ref)

    _, w = pred_ref.shape
    rpp = tgt_ref.shape[1]
    c = w // rpp

    # Single-vreg lane iota; broadcast happens inside the compare.
    lane = jax.lax.broadcasted_iota(jnp.int32, (1, w), 1).astype(jnp.float32)

    if rpp == 1:
        # Unpacked path: one target column, lane-broadcast in the compare.
        tgt_map = tgt_ref[...].astype(jnp.float32)                 # (TR, 1)
    else:
        # Expand targets (TR, RPP) -> (TR, W) on the idle MXU with a tiny
        # constant selector matrix: E[j, l] = 1.0 iff lane l belongs to sub-row j.
        l_iota = jax.lax.broadcasted_iota(jnp.int32, (rpp, w), 1)
        lo = jax.lax.broadcasted_iota(jnp.int32, (rpp, w), 0) * c
        expand = jnp.logical_and(l_iota >= lo, l_iota < lo + c).astype(jnp.float32)
        tgt_map = jnp.dot(tgt_ref[...].astype(jnp.float32), expand,
                          preferred_element_type=jnp.float32)      # (TR, W)

    mask = lane == tgt_map                                         # 1 cmp / vreg
    picked = jnp.where(mask, pred_ref[...].astype(jnp.float32), 0.0)
    out_ref[...] += jnp.sum(picked, axis=0, keepdims=True).reshape(out_ref.shape)


def nll_loss(pred, target, ignore_index=-100):
    """F.nll_loss(pred, target, reduction='mean', ignore_index=-100) on TPU.

    pred  : (N, C) log-probabilities (float32 or bfloat16).
    target: (N,) integer class ids; entries == ignore_index are excluded from
            both numerator and denominator (PyTorch semantics).
    NOTE: out-of-range targets other than ignore_index are not validated; they
          silently contribute 0 where PyTorch would raise.
    """
    n, c = pred.shape
    target = target.astype(jnp.int32)
    itemsize = pred.dtype.itemsize

    # ---- lane packing: fold rows into 128-wide rows only when it is free ----
    if c <= 64 and (c & (c - 1)) == 0:
        rpp = max(1, min(128 // c, n & -n))     # pow2, divides n -> free reshape
    else:
        rpp = 1                                  # full-dim C block, no class pad
    w = rpp * c
    n_pack = n // rpp

    # ---- tile sizing: ~2 MiB of pred per step, dtype-aware, sublane-aligned ----
    target_bytes = 2 * 1024 * 1024
    tr = max(8, (target_bytes // max(1, w * itemsize)) // 8 * 8)
    if tr >= n_pack:
        tr = n_pack                              # single (full-dim) block
    total_blocks = pl.cdiv(n_pack, tr)
    last_blk = total_blocks - 1

    num_shards = 2 if (_num_tensorcore_shards() == 2 and total_blocks >= 2) else 1
    steps = pl.cdiv(total_blocks, num_shards)
    grid_rows = num_shards * steps * tr          # rows covered by target blocks

    # Flat lane offset of each row's target inside its packed row; -1 never matches.
    valid = target != ignore_index
    sub = (jnp.arange(n, dtype=jnp.int32) % rpp) * c
    lane_off = jnp.where(valid, sub + target, -1)
    if grid_rows * rpp != n:                     # pad ONLY the tiny target array
        lane_off = jnp.pad(lane_off, (0, grid_rows * rpp - n), constant_values=-1)
    tgt_packed = lane_off.reshape(grid_rows, rpp)

    pred_packed = pred.reshape(n_pack, w)        # contiguous row-major: free view

    partials = pl.pallas_call(
        _nll_pick_sum_kernel,
        out_shape=jax.ShapeDtypeStruct((num_shards, 1, w), jnp.float32),
        grid_spec=pltpu.PrefetchScalarGridSpec(
            num_scalar_prefetch=0,
            grid=(num_shards, steps),
            in_specs=[
                # pred: clamp the block index so the grid tail never reads OOB;
                # the redundant block is masked to 0 by the -1 padded targets.
                pl.BlockSpec(
                    (tr, w),
                    lambda sh, s: (jnp.minimum(sh * steps + s, last_blk), 0)),
                pl.BlockSpec((tr, rpp), lambda sh, s: (sh * steps + s, 0)),
            ],
            out_specs=pl.BlockSpec((1, 1, w), lambda sh, s: (sh, 0, 0)),
        ),
        compiler_params=pltpu.CompilerParams(
            dimension_semantics=("parallel", "arbitrary"),
            vmem_limit_bytes=32 * 1024 * 1024,
        ),
    )(pred_packed, tgt_packed)

    picked_sum = jnp.sum(partials)               # num_shards * W floats: trivial
    n_valid = jnp.sum(valid).astype(jnp.float32)
    return -picked_sum / n_valid


class GetLoss:
    """Pallas port of segmentation/models/Point_M2AE_SEG.py::get_loss."""

    def __call__(self, pred, target):
        return nll_loss(pred, target)


if __name__ == "__main__":
    key = jax.random.PRNGKey(0)
    k1, k2, k3, k4, k5, k6, k7 = jax.random.split(key, 7)
    loss_mod = GetLoss()

    # ---- test 1: module-sized case (N=128 points, 16 part classes), f32 & bf16 ----
    N1, C1 = 128, 16
    logits1 = jax.random.normal(k1, (N1, C1), dtype=jnp.float32)
    pred1 = jax.nn.log_softmax(logits1, axis=-1)       # nll_loss expects log-probs
    tgt1 = jax.random.randint(k2, (N1,), 0, C1, dtype=jnp.int32)
    loss1 = loss_mod(pred1, tgt1)
    jax.block_until_ready(loss1)
    ref1 = -jnp.mean(pred1[jnp.arange(N1), tgt1])
    assert jnp.allclose(loss1, ref1, atol=1e-5, rtol=1e-5), (loss1, ref1)

    loss1_bf16 = loss_mod(pred1.astype(jnp.bfloat16), tgt1)
    jax.block_until_ready(loss1_bf16)
    pred1_rt = pred1.astype(jnp.bfloat16).astype(jnp.float32)
    ref1_bf16 = -jnp.mean(pred1_rt[jnp.arange(N1), tgt1])
    assert jnp.allclose(loss1_bf16, ref1_bf16, atol=1e-2, rtol=1e-2), (loss1_bf16, ref1_bf16)

    # ---- test 2: non-pow2 classes (unpacked full-dim-C path) + ignore_index ----
    N2, C2 = 2600, 50
    logits2 = jax.random.normal(k3, (N2, C2), dtype=jnp.float32)
    pred2 = jax.nn.log_softmax(logits2, axis=-1)
    tgt2 = jax.random.randint(k4, (N2,), 0, C2, dtype=jnp.int32)
    drop = jax.random.uniform(k5, (N2,)) < 0.05
    tgt2 = jnp.where(drop, -100, tgt2)
    loss2 = loss_mod(pred2, tgt2)
    jax.block_until_ready(loss2)
    valid2 = tgt2 != -100
    picked2 = jnp.where(valid2, pred2[jnp.arange(N2), jnp.where(valid2, tgt2, 0)], 0.0)
    ref2 = -jnp.sum(picked2) / jnp.sum(valid2)
    assert jnp.allclose(loss2, ref2, atol=1e-4, rtol=1e-4), (loss2, ref2)

    # ---- test 3: multi-block packed path with a partial tail block ----
    N3, C3 = 32808, 16          # 32808 = 8*4101 -> rpp=8, ~2 MiB tiles -> 2 blocks
    logits3 = jax.random.normal(k6, (N3, C3), dtype=jnp.float32)
    pred3 = jax.nn.log_softmax(logits3, axis=-1)
    tgt3 = jax.random.randint(k7, (N3,), 0, C3, dtype=jnp.int32)
    loss3 = loss_mod(pred3, tgt3)
    jax.block_until_ready(loss3)
    ref3 = -jnp.mean(pred3[jnp.arange(N3), tgt3])
    assert jnp.allclose(loss3, ref3, atol=1e-4, rtol=1e-4), (loss3, ref3)

    # ---- test 4: N not divisible by 128//C -> reduced rows_per_pack, zero copies ----
    N4, C4 = 100, 16            # largest pow2 divisor of 100 is 4 -> rpp=4, W=64
    logits4 = jax.random.normal(k1, (N4, C4), dtype=jnp.float32)
    pred4 = jax.nn.log_softmax(logits4, axis=-1)
    tgt4 = jax.random.randint(k2, (N4,), 0, C4, dtype=jnp.int32)
    loss4 = loss_mod(pred4, tgt4)
    jax.block_until_ready(loss4)
    ref4 = -jnp.mean(pred4[jnp.arange(N4), tgt4])
    assert jnp.allclose(loss4, ref4, atol=1e-5, rtol=1e-5), (loss4, ref4)

    print("KERNEL_OK")
</pallas_src>

<mosaic_0001>
module attributes {stable_mosaic.version = 11 : i64} {
  func.func @_nll_pick_sum_kernel(%arg0: i32, %arg1: i32, %arg2: memref<16x128xf32, #tpu.memory_space<vmem>>, %arg3: memref<16x8xi32, #tpu.memory_space<vmem>>, %arg4: memref<1x1x128xf32, #tpu.memory_space<vmem>>) attributes {dimension_semantics = [#tpu.dimension_semantics<parallel>, #tpu.dimension_semantics<arbitrary>], iteration_bounds = array<i64: 1, 1>, scalar_prefetch = 0 : i64, scratch_operands = 0 : i64, tpu.core_type = #tpu.core_type<tc>, window_params = [{transform_indices = @transform_0, window_bounds = array<i64: 16, 128>}, {transform_indices = @transform_1, window_bounds = array<i64: 16, 8>}, {transform_indices = @transform_2, window_bounds = array<i64: 1, 1, 128>}]} {
    %c0_i32 = arith.constant 0 : i32
    %0 = arith.cmpi eq, %arg1, %c0_i32 : i32
    %1 = arith.extui %0 : i1 to i32
    %c0_i32_0 = arith.constant 0 : i32
    %2 = arith.cmpi ne, %1, %c0_i32_0 : i32
    scf.if %2 {
      %cst_13 = arith.constant 0.000000e+00 : f32
      %30 = vector.broadcast %cst_13 : f32 to vector<1x1x128xf32>
      %c0_14 = arith.constant 0 : index
      %c0_15 = arith.constant 0 : index
      %c0_16 = arith.constant 0 : index
      %31 = vector.load %arg4[%c0_14, %c0_15, %c0_16] : memref<1x1x128xf32, #tpu.memory_space<vmem>>, vector<1x1x128xf32>
      tpu.vector_store %arg4[%c0_14, %c0_15, %c0_16], %30 {strides = array<i32>} : memref<1x1x128xf32, #tpu.memory_space<vmem>>, vector<1x1x128xf32>,
    } else {
    }
    %3 = tpu.iota {dimensions = array<i32: 1>} : vector<1x128xi32>
    %4 = arith.sitofp %3 : vector<1x128xi32> to vector<1x128xf32>
    %5 = tpu.iota {dimensions = array<i32: 1>} : vector<8x128xi32>
    %6 = tpu.iota {dimensions = array<i32: 0>} : vector<8x128xi32>
    %c16_i32 = arith.constant 16 : i32
    %7 = vector.broadcast %c16_i32 : i32 to vector<8x128xi32>
    %8 = arith.muli %6, %7 : vector<8x128xi32>
    %9 = arith.cmpi sge, %5, %8 : vector<8x128xi32>
    %c16_i32_1 = arith.constant 16 : i32
    %10 = vector.broadcast %c16_i32_1 : i32 to vector<8x128xi32>
    %11 = arith.addi %8, %10 : vector<8x128xi32>
    %12 = arith.cmpi slt, %5, %11 : vector<8x128xi32>
    %13 = arith.andi %9, %12 : vector<8x128xi1>
    %14 = arith.extui %13 : vector<8x128xi1> to vector<8x128xi32>
    %15 = arith.sitofp %14 : vector<8x128xi32> to vector<8x128xf32>
    %c0 = arith.constant 0 : index
    %c0_2 = arith.constant 0 : index
    %16 = vector.load %arg3[%c0, %c0_2] : memref<16x8xi32, #tpu.memory_space<vmem>>, vector<16x8xi32>
    %17 = arith.sitofp %16 : vector<16x8xi32> to vector<16x8xf32>
    %cst = arith.constant dense<0.000000e+00> : vector<16x128xf32>
    %18 = tpu.matmul %17, %15, %cst {dimension_numbers = #tpu.dot_dimension_numbers<[1], [0], [0], [1], [0, 0, 1, 1], [], []>} : vector<16x8xf32>, vector<8x128xf32>, vector<16x128xf32> -> vector<16x128xf32>
    %19 = vector.broadcast %4 : vector<1x128xf32> to vector<16x128xf32>
    %20 = arith.cmpf oeq, %19, %18 : vector<16x128xf32>
    %c0_3 = arith.constant 0 : index
    %c0_4 = arith.constant 0 : index
    %21 = vector.load %arg2[%c0_3, %c0_4] : memref<16x128xf32, #tpu.memory_space<vmem>>, vector<16x128xf32>
    %cst_5 = arith.constant 0.000000e+00 : f32
    %22 = vector.broadcast %cst_5 : f32 to vector<16x128xf32>
    %23 = arith.select %20, %21, %22 : vector<16x128xi1>, vector<16x128xf32>
    %c0_6 = arith.constant 0 : index
    %c0_7 = arith.constant 0 : index
    %c0_8 = arith.constant 0 : index
    %24 = vector.load %arg4[%c0_6, %c0_7, %c0_8] : memref<1x1x128xf32, #tpu.memory_space<vmem>>, vector<1x1x128xf32>
    %cst_9 = arith.constant dense<0.000000e+00> : vector<128xf32>
    %25 = vector.multi_reduction <add>, %23, %cst_9 [0] : vector<16x128xf32> to vector<128xf32>
    %26 = vector.shape_cast %25 : vector<128xf32> to vector<1x128xf32>
    %27 = vector.shape_cast %26 : vector<1x128xf32> to vector<1x1x128xf32>
    %28 = arith.addf %24, %27 : vector<1x1x128xf32>
    %c0_10 = arith.constant 0 : index
    %c0_11 = arith.constant 0 : index
    %c0_12 = arith.constant 0 : index
    %29 = vector.load %arg4[%c0_10, %c0_11, %c0_12] : memref<1x1x128xf32, #tpu.memory_space<vmem>>, vector<1x1x128xf32>
    tpu.vector_store %arg4[%c0_10, %c0_11, %c0_12], %28 {strides = array<i32>} : memref<1x1x128xf32, #tpu.memory_space<vmem>>, vector<1x1x128xf32>,
    return
  }
  func.func @transform_0(%arg0: i32, %arg1: i32) -> (i32, i32) {
    %c1_i32 = arith.constant 1 : i32
    %0 = arith.muli %arg0, %c1_i32 : i32
    %1 = arith.addi %0, %arg1 : i32
    %c0_i32 = arith.constant 0 : i32
    %2 = arith.minsi %1, %c0_i32 : i32
    %c0_i32_0 = arith.constant 0 : i32
    %c0_i32_1 = arith.constant 0 : i32
    return %2, %c0_i32_0 : i32, i32
  }
  func.func @transform_1(%arg0: i32, %arg1: i32) -> (i32, i32) {
    %c1_i32 = arith.constant 1 : i32
    %0 = arith.muli %arg0, %c1_i32 : i32
    %1 = arith.addi %0, %arg1 : i32
    %c0_i32 = arith.constant 0 : i32
    %c0_i32_0 = arith.constant 0 : i32
    return %1, %c0_i32 : i32, i32
  }
  func.func @transform_2(%arg0: i32, %arg1: i32) -> (i32, i32, i32) {
    %c0_i32 = arith.constant 0 : i32
    %c0_i32_0 = arith.constant 0 : i32
    %c0_i32_1 = arith.constant 0 : i32
    return %arg0, %c0_i32, %c0_i32_0 : i32, i32, i32
  }
}

</mosaic_0001>

<bundles_post_ra>
// kernel: tpu_custom_call.1
= control target key start
LH: loop header
LB: loop body
LE: loop exit
PB: predicated region body
PF: predicated region fallthrough
CT: control target
= control target key end

     0   :  { %v71_v0 = vlaneseq  ;;  %vm87_vm0 = vcmask 64512   ;;  %s294_s0 = inlined_call_operand.vmem [shape: f32[16,128], index: 0, kind: input, shape index: {}]   ;;  %s295_s1 = inlined_call_operand.vmem [shape: s32[16,8], index: 1, kind: input, shape index: {}]   ;;  %s296_s2 = inlined_call_operand.hbm [shape: f32[1,1,128], index: 2, kind: output, shape index: {}]  }
   0x1   :  { %v83_v1 = vld [vmem:[%s295_s1] sm:$0xff] }
   0x2   :  { %7 = vsyncpa [#allocation3], 0  ;;  %v85_v2 = vcvt.s32.f32 %v83_v1  ;;  %v72_v3 = vand.u32 127, %v71_v0  ;;  %v75_v4 = vshrl.u32 %v71_v0, 7  ;;  %v84_v6 = vld [vmem:[%s295_s1 + $0x8] sm:$0xff]  ;;  %v250_v9 = vmov 1.0  }
   0x3   :  { %v86_v8 = vcvt.s32.f32 %v84_v6  ;;  %v251_v10 = vmov 0.0   ;;  %v172_v12 = vld [vmem:[%s294_s0 + $0x8] sm:$0xff]  ;;  %v171_v14 = vld [vmem:[%s294_s0] sm:$0xff]  ;;  %s252_s16 = smov [#allocation2]  }
   0x4   :  { %220 = vmatprep.mubr.msk.f32.mxu0 %vm87_vm0, %v85_v2  ;;  %v76_v5 = vmul.u32 16, %v75_v4  ;;  %70 = vst [vmem:[#allocation2] sm:$0x1] %v251_v10  ;;  %v73_v11 = vcvt.s32.f32 %v72_v3  ;;  %s191_s17 = sshll.u32 %s252_s16, 4  ;;  %s192_s17 = int_to_ptr.vmem [resolvable:$true] %s191_s17 }
   0x5   :  { %s226_s18 = scalar_lea.vmem %s192_s17, 16  ;;  %s230_s0 = scalar_lea.vmem %s192_s17, 32 }
   0x6   :  { %vm77_vm1 = vcmp.ge.s32.totalorder %v72_v3, %v76_v5  ;;  %v78_v7 = vadd.s32 16, %v76_v5  ;;  %p227_p0 = scmp.ne.s32.totalorder %s192_s17, %s226_s18  ;;  %p231_p1 = scmp.lt.s32.totalorder %s192_s17, %s192_s17 }
   0x7   :  { %p232_p2 = scmp.lt.s32.totalorder %s230_s0, %s226_s18 }
   0x8   :  { %vm79_vm2 = vcmp.lt.s32.totalorder %v72_v3, %v78_v7 }
   0x9   :  { %vm80_vm3 = vmand %vm77_vm1, %vm79_vm2  ;;  %p233_p3 = por %p232_p2, %p231_p1 }
   0xa   :  { %218 = vmatprep.subr.msk.mxu0 %vm80_vm3, %v250_v9 }
   0xb   :  { %219 = vmatpush3.msk.msra.mxu0 %vm80_vm3, %v250_v9  ;;  %v175_v24 = vld [vmem:[#allocation2] sm:$0x1]  ;;  %p234_p4 = pnand %p233_p3, %p227_p0 }
   0xc   :  { %221 = vmatmul.mubr.msk.f32.vlgmr.msra.gmra.mrb[0].mxu0 %vm87_vm0, %v86_v8 }
  0xdf   :  { %v222_v13 = vpop.f32.mrb[0].mxu0 }
  0xe0   :  { %vm170_vm4 = vcmp.eq.f32.partialorder %v73_v11, %v222_v13  ;;  %v160_v15 = vpop.f32.mrb[1].mxu0 }
  0xe1   :  { %v174_v16 = vsel %vm170_vm4, %v172_v12, 0.0  ;;  %vm169_vm5 = vcmp.eq.f32.partialorder %v73_v11, %v160_v15 }
  0xe2   :  { %v173_v17 = vsel %vm169_vm5, %v171_v14, 0.0 }
  0xe3   :  { %v176_v18 = vadd.f32 %v174_v16, %v173_v17 }
  0xe5   :  { %v177_v19 = vrot.slane %v176_v18, 4 }
  0xe7   :  { %v178_v20 = vadd.f32 %v177_v19, %v176_v18 }
  0xe9   :  { %v179_v21 = vrot.slane %v178_v20, 2 }
  0xeb   :  { %v180_v22 = vadd.f32 %v179_v21, %v178_v20 }
  0xed   :  { %v181_v23 = vrot.slane %v180_v22, 1 }
  0xef   :  { %v182_v25 = vadd.f32 %v181_v23, %v180_v22 }
  0xf1   :  { %v183_v26 = vadd.f32 %v182_v25, %v175_v24 }
  0xf3   :  { %184 = vst [vmem:[#allocation2] sm:$0x1] %v183_v26 }
  0xf4   :  { %237 = shalt.err (!%p234_p4)
}
  0xf5   :  { %s238_s21 = scalar_lea.hbm %s296_s2, 16 }
  0xf6   :  { %p239_p5 = scmp.ne.s32.totalorder %s296_s2, %s238_s21  ;;  %p242_p6 = scmp.lt.u32.totalorder %s238_s21, %s296_s2 }
  0xf8   :  { %p244_p7 = pnand %p242_p6, %p239_p5 }
  0xfa   :  { %247 = shalt.err (!%p244_p7)
}
  0xfb   :  { %194 = dma.vmem_to_hbm [thread:$0]  %s192_s17, 16, %s296_s2, [#allocation3]  }
  0xfc   :  { %248 = dma.done.wait [#allocation3], 16  }
  0xfd   :  { %249 = vsyncadd [#allocation3], 4294967280 }
  0xfe   :  { %198 = vsyncpa [#allocation3], 1 }

</bundles_post_ra>
